<compile_context>
chip_gen: v5e
topology: v5e:2x2
jax: 0.10.0
libtpu: 0.0.40
codegen_flags: <defaults>
</compile_context>

<pallas_src>
import jax
import jax.numpy as jnp
from jax.experimental import pallas as pl
from jax.experimental.pallas import tpu as pltpu

EPS = 1e-5


def _round_up(v, m):
    return ((v + m - 1) // m) * m


def _cdiv(a, b):
    return (a + b - 1) // b


def _vmem_budget(*buffer_bytes):
    # Double-buffered pipeline copies of every operand/result tile + slack for
    # Mosaic-internal temporaries; 16 MiB floor for tiny problems, capped well
    # below physical VMEM.
    return int(min(max(2 * sum(buffer_bytes) + (4 << 20), 16 << 20), 96 << 20))


# ---------------------------------------------------------------------------
# Kernel 1: conv matmul (bf16 operands, f32 accumulate) -> per-channel partials.
# y is NOT written back to HBM (recomputed in pass 2).
# ---------------------------------------------------------------------------
def conv_stats_kernel(w_ref, p_ref, sum_ref, ssq_ref):
    # w_ref: (OC_pad, K_pad) bf16 resident; p_ref: (1, K_pad, tile_m) bf16
    y = jnp.dot(w_ref[...], p_ref[0], preferred_element_type=jnp.float32)
    sum_ref[...] = jnp.sum(y, axis=1, keepdims=True).reshape(sum_ref.shape)
    ssq_ref[...] = jnp.sum(y * y, axis=1, keepdims=True).reshape(ssq_ref.shape)


# ---------------------------------------------------------------------------
# Kernel 2: recompute conv matmul, fuse folded BN (scale/shift) + ReLU.
# Output written lane-dense in the final (N, OC, OH*OW) layout.
# ---------------------------------------------------------------------------
def conv_bn_relu_kernel(w_ref, scale_ref, shift_ref, p_ref, o_ref):
    y = jnp.dot(w_ref[...], p_ref[0], preferred_element_type=jnp.float32)
    o_ref[0] = jnp.maximum(y * scale_ref[...] + shift_ref[...], 0.0)


def _im2col_t(x, kh, kw, stride, padding):
    """x: (N, C, H, W) -> P^T (N, C*KH*KW, OH*OW) in x.dtype, plus (OH, OW)."""
    n, c, h, w = x.shape
    xp = jnp.pad(x, ((0, 0), (0, 0), (padding, padding), (padding, padding)))
    oh = (h + 2 * padding - kh) // stride + 1
    ow = (w + 2 * padding - kw) // stride + 1
    taps = []
    for i in range(kh):
        for j in range(kw):
            taps.append(xp[:, :, i:i + stride * oh:stride, j:j + stride * ow:stride])
    # (KH*KW, N, C, OH, OW) -> (N, C, KH*KW, OH, OW); K index = c*KH*KW + i*KW + j
    stk = jnp.stack(taps, axis=0).transpose(1, 2, 0, 3, 4)
    return stk.reshape(n, c * kh * kw, oh * ow), oh, ow


def conv2d_block_forward(x, weight, gamma, beta, stride, padding, *, tile_m=1024):
    """x: (N, C, H, W) f32; weight: (OC, C, KH, KW) f32. Returns (N, OC, OH, OW) f32."""
    n, c, h, w = x.shape
    oc, _, kh, kw = weight.shape
    k = c * kh * kw

    # Patch matrix built directly in bf16 (one padded bf16 materialization only).
    pt, oh, ow = _im2col_t(x.astype(jnp.bfloat16), kh, kw, stride, padding)
    m_img = oh * ow                      # output positions per image
    m_total = n * m_img                  # BN reduction count (true, unpadded)

    k_pad = _round_up(k, 16)             # bf16 sublane granule (not 128: K is off-lane)
    oc_pad = _round_up(oc, 16)           # sublane granule only (OC is off-lane)

    # ---- tile_m: lane-axis tile, 256-aligned, >= 2 grid steps when possible (v7x) ----
    gran = 256 if _round_up(m_img, 128) >= 256 else 128
    tile = min(_round_up(tile_m, gran), _round_up(m_img, gran))
    if n * _cdiv(m_img, tile) < 2 and _round_up(m_img, 128) >= 256:
        tile = _round_up(_cdiv(_round_up(m_img, 128), 2), 128)
    m_pad = _round_up(m_img, tile)
    t_steps = m_pad // tile

    pt_p = jnp.pad(pt, ((0, 0), (0, k_pad - k), (0, m_pad - m_img)))           # bf16
    w_p = jnp.pad(weight.reshape(oc, k),
                  ((0, oc_pad - oc), (0, k_pad - k))).astype(jnp.bfloat16)
    gamma_p = jnp.pad(gamma.astype(jnp.float32), (0, oc_pad - oc))
    beta_p = jnp.pad(beta.astype(jnp.float32), (0, oc_pad - oc))

    cparams = pltpu.CompilerParams(
        dimension_semantics=("parallel", "parallel"),        # megacore-safe on v7x
        vmem_limit_bytes=_vmem_budget(
            oc_pad * k_pad * 2, k_pad * tile * 2, oc_pad * tile * 4, 2 * oc_pad * 4))

    # ---- pass 1: stats only (per-tile per-channel sum / sum of squares) -------------
    sums, ssqs = pl.pallas_call(
        conv_stats_kernel,
        grid=(n, t_steps),
        in_specs=[
            pl.BlockSpec((oc_pad, k_pad), lambda b, t: (0, 0)),       # resident weight
            pl.BlockSpec((1, k_pad, tile), lambda b, t: (b, 0, t)),
        ],
        out_specs=(
            pl.BlockSpec((1, 1, oc_pad, 1), lambda b, t: (b, t, 0, 0)),
            pl.BlockSpec((1, 1, oc_pad, 1), lambda b, t: (b, t, 0, 0)),
        ),
        out_shape=(
            jax.ShapeDtypeStruct((n, t_steps, oc_pad, 1), jnp.float32),
            jax.ShapeDtypeStruct((n, t_steps, oc_pad, 1), jnp.float32),
        ),
        compiler_params=cparams,
        cost_estimate=pl.CostEstimate(
            flops=2 * n * m_pad * oc_pad * k_pad + 3 * n * m_pad * oc_pad,
            transcendentals=0,
            bytes_accessed=n * k_pad * m_pad * 2 + oc_pad * k_pad * 2
                           + 2 * n * t_steps * oc_pad * 4),
    )(w_p, pt_p)

    # ---- tiny per-channel reduction + BN fold (pure XLA, O(OC) work) -----------------
    sum_y = jnp.sum(sums[..., 0], axis=(0, 1))        # padded rows/cols contribute zero
    sum_y2 = jnp.sum(ssqs[..., 0], axis=(0, 1))
    mean = sum_y / m_total
    var = jnp.maximum(sum_y2 / m_total - mean * mean, 0.0)    # biased var (train mode)
    scale_v = gamma_p * jax.lax.rsqrt(var + EPS)
    shift_v = beta_p - mean * scale_v
    scale = scale_v[:, None]                           # (OC_pad, 1): broadcasts over lanes
    shift = shift_v[:, None]

    # ---- pass 2: recompute matmul + folded BN + ReLU, writes final layout ------------
    out3 = pl.pallas_call(
        conv_bn_relu_kernel,
        grid=(n, t_steps),
        in_specs=[
            pl.BlockSpec((oc_pad, k_pad), lambda b, t: (0, 0)),
            pl.BlockSpec((oc_pad, 1), lambda b, t: (0, 0)),
            pl.BlockSpec((oc_pad, 1), lambda b, t: (0, 0)),
            pl.BlockSpec((1, k_pad, tile), lambda b, t: (b, 0, t)),
        ],
        out_specs=pl.BlockSpec((1, oc_pad, tile), lambda b, t: (b, 0, t)),
        out_shape=jax.ShapeDtypeStruct((n, oc_pad, m_pad), jnp.float32),
        compiler_params=cparams,
        cost_estimate=pl.CostEstimate(
            flops=2 * n * m_pad * oc_pad * k_pad + 3 * n * m_pad * oc_pad,
            transcendentals=0,
            bytes_accessed=n * k_pad * m_pad * 2 + oc_pad * k_pad * 2
                           + n * oc_pad * m_pad * 4 + 2 * oc_pad * 4),
    )(w_p, scale, shift, pt_p)

    # (N, OC_pad, M_pad) -> NCHW.  When oc_pad == oc and m_pad == m_img (as in the
    # demo config) this is a pure metadata reshape: no slice copy, no transpose.
    return out3[:, :oc, :m_img].reshape(n, oc, oh, ow)


def reference_forward(x, weight, gamma, beta, stride, padding):
    """Pure-JAX f32 reference: Conv2d -> BatchNorm2d (train mode) -> ReLU."""
    y = jax.lax.conv_general_dilated(
        x, weight, window_strides=(stride, stride),
        padding=[(padding, padding), (padding, padding)],
        dimension_numbers=("NCHW", "OIHW", "NCHW"))
    mean = jnp.mean(y, axis=(0, 2, 3), keepdims=True)
    var = jnp.mean((y - mean) ** 2, axis=(0, 2, 3), keepdims=True)
    y_hat = (y - mean) * jax.lax.rsqrt(var + EPS)
    out = y_hat * gamma.reshape(1, -1, 1, 1) + beta.reshape(1, -1, 1, 1)
    return jnp.maximum(out, 0.0)


if __name__ == "__main__":
    # DSH-style config: Conv2dBlock(input_nc=1, output_nc=16, kernel_size=5,
    # stride=2, padding=2, use_bias=False)
    input_nc, output_nc, kernel_size, stride, padding = 1, 16, 5, 2, 2

    key = jax.random.PRNGKey(0)
    kx, kw_, kg, kb = jax.random.split(key, 4)

    x = jax.random.normal(kx, (2, input_nc, 32, 32), dtype=jnp.float32)
    weight = 0.1 * jax.random.normal(
        kw_, (output_nc, input_nc, kernel_size, kernel_size), dtype=jnp.float32)
    # BN defaults are gamma=1, beta=0; perturb slightly to exercise the affine fold.
    gamma = 1.0 + 0.1 * jax.random.normal(kg, (output_nc,), dtype=jnp.float32)
    beta = 0.1 * jax.random.normal(kb, (output_nc,), dtype=jnp.float32)

    fwd = jax.jit(conv2d_block_forward, static_argnames=("stride", "padding", "tile_m"))
    out = fwd(x, weight, gamma, beta, stride=stride, padding=padding)
    jax.block_until_ready(out)

    ref = reference_forward(x, weight, gamma, beta, stride, padding)

    assert out.shape == (2, output_nc, 16, 16), out.shape
    assert bool(jnp.all(out >= 0.0))
    err = float(jnp.max(jnp.abs(out - ref)))
    assert err < 0.1, f"max abs err {err}"   # bf16 MXU operands, f32 accumulation/BN
    print("KERNEL_OK")
</pallas_src>

<mosaic_0001>
module attributes {stable_mosaic.version = 11 : i64} {
  func.func @conv_stats_kernel(%arg0: i32, %arg1: i32, %arg2: memref<16x32xbf16, #tpu.memory_space<vmem>>, %arg3: memref<1x32x256xbf16, #tpu.memory_space<vmem>>, %arg4: memref<1x1x16x1xf32, #tpu.memory_space<vmem>>, %arg5: memref<1x1x16x1xf32, #tpu.memory_space<vmem>>) attributes {dimension_semantics = [#tpu.dimension_semantics<parallel>, #tpu.dimension_semantics<parallel>], iteration_bounds = array<i64: 2, 1>, scalar_prefetch = 0 : i64, scratch_operands = 0 : i64, tpu.core_type = #tpu.core_type<tc>, window_params = [{pipeline_mode = #tpu.pipeline_mode<synchronous>, transform_indices = @transform_0, window_bounds = array<i64: 16, 32>}, {transform_indices = @transform_1, window_bounds = array<i64: 1, 32, 256>}, {transform_indices = @transform_2, window_bounds = array<i64: 1, 1, 16, 1>}, {transform_indices = @transform_3, window_bounds = array<i64: 1, 1, 16, 1>}]} {
    %c0 = arith.constant 0 : index
    %c0_0 = arith.constant 0 : index
    %0 = vector.load %arg2[%c0, %c0_0] : memref<16x32xbf16, #tpu.memory_space<vmem>>, vector<16x32xbf16>
    %c0_1 = arith.constant 0 : index
    %c0_2 = arith.constant 0 : index
    %c0_3 = arith.constant 0 : index
    %1 = vector.load %arg3[%c0_1, %c0_2, %c0_3] : memref<1x32x256xbf16, #tpu.memory_space<vmem>>, vector<1x32x256xbf16>
    %2 = vector.shape_cast %1 : vector<1x32x256xbf16> to vector<32x256xbf16>
    %cst = arith.constant dense<0.000000e+00> : vector<16x256xf32>
    %3 = tpu.matmul %0, %2, %cst {dimension_numbers = #tpu.dot_dimension_numbers<[1], [0], [0], [1], [0, 0, 1, 1], [], []>} : vector<16x32xbf16>, vector<32x256xbf16>, vector<16x256xf32> -> vector<16x256xf32>
    %cst_4 = arith.constant dense<0.000000e+00> : vector<16xf32>
    %4 = vector.multi_reduction <add>, %3, %cst_4 [1] : vector<16x256xf32> to vector<16xf32>
    %5 = vector.shape_cast %4 : vector<16xf32> to vector<16x1xf32>
    %6 = vector.shape_cast %5 : vector<16x1xf32> to vector<1x1x16x1xf32>
    %c0_5 = arith.constant 0 : index
    %c0_6 = arith.constant 0 : index
    %c0_7 = arith.constant 0 : index
    %c0_8 = arith.constant 0 : index
    %7 = vector.load %arg4[%c0_5, %c0_6, %c0_7, %c0_8] : memref<1x1x16x1xf32, #tpu.memory_space<vmem>>, vector<1x1x16x1xf32>
    tpu.vector_store %arg4[%c0_5, %c0_6, %c0_7, %c0_8], %6 {strides = array<i32>} : memref<1x1x16x1xf32, #tpu.memory_space<vmem>>, vector<1x1x16x1xf32>,
    %8 = arith.mulf %3, %3 : vector<16x256xf32>
    %cst_9 = arith.constant dense<0.000000e+00> : vector<16xf32>
    %9 = vector.multi_reduction <add>, %8, %cst_9 [1] : vector<16x256xf32> to vector<16xf32>
    %10 = vector.shape_cast %9 : vector<16xf32> to vector<16x1xf32>
    %11 = vector.shape_cast %10 : vector<16x1xf32> to vector<1x1x16x1xf32>
    %c0_10 = arith.constant 0 : index
    %c0_11 = arith.constant 0 : index
    %c0_12 = arith.constant 0 : index
    %c0_13 = arith.constant 0 : index
    %12 = vector.load %arg5[%c0_10, %c0_11, %c0_12, %c0_13] : memref<1x1x16x1xf32, #tpu.memory_space<vmem>>, vector<1x1x16x1xf32>
    tpu.vector_store %arg5[%c0_10, %c0_11, %c0_12, %c0_13], %11 {strides = array<i32>} : memref<1x1x16x1xf32, #tpu.memory_space<vmem>>, vector<1x1x16x1xf32>,
    return
  }
  func.func @transform_0(%arg0: i32, %arg1: i32) -> (i32, i32) {
    %c0_i32 = arith.constant 0 : i32
    %c0_i32_0 = arith.constant 0 : i32
    %c0_i32_1 = arith.constant 0 : i32
    return %c0_i32, %c0_i32_0 : i32, i32
  }
  func.func @transform_1(%arg0: i32, %arg1: i32) -> (i32, i32, i32) {
    %c0_i32 = arith.constant 0 : i32
    %c0_i32_0 = arith.constant 0 : i32
    return %arg0, %c0_i32, %arg1 : i32, i32, i32
  }
  func.func @transform_2(%arg0: i32, %arg1: i32) -> (i32, i32, i32, i32) {
    %c0_i32 = arith.constant 0 : i32
    %c0_i32_0 = arith.constant 0 : i32
    %c0_i32_1 = arith.constant 0 : i32
    return %arg0, %arg1, %c0_i32, %c0_i32_0 : i32, i32, i32, i32
  }
  func.func @transform_3(%arg0: i32, %arg1: i32) -> (i32, i32, i32, i32) {
    %c0_i32 = arith.constant 0 : i32
    %c0_i32_0 = arith.constant 0 : i32
    %c0_i32_1 = arith.constant 0 : i32
    return %arg0, %arg1, %c0_i32, %c0_i32_0 : i32, i32, i32, i32
  }
}

module attributes {stable_mosaic.version = 11 : i64} {
  func.func @conv_bn_relu_kernel(%arg0: i32, %arg1: i32, %arg2: memref<16x32xbf16, #tpu.memory_space<vmem>>, %arg3: memref<16x1xf32, #tpu.memory_space<vmem>>, %arg4: memref<16x1xf32, #tpu.memory_space<vmem>>, %arg5: memref<1x32x256xbf16, #tpu.memory_space<vmem>>, %arg6: memref<1x16x256xf32, #tpu.memory_space<vmem>>) attributes {dimension_semantics = [#tpu.dimension_semantics<parallel>, #tpu.dimension_semantics<parallel>], iteration_bounds = array<i64: 2, 1>, scalar_prefetch = 0 : i64, scratch_operands = 0 : i64, tpu.core_type = #tpu.core_type<tc>, window_params = [{pipeline_mode = #tpu.pipeline_mode<synchronous>, transform_indices = @transform_0, window_bounds = array<i64: 16, 32>}, {pipeline_mode = #tpu.pipeline_mode<synchronous>, transform_indices = @transform_1, window_bounds = array<i64: 16, 1>}, {pipeline_mode = #tpu.pipeline_mode<synchronous>, transform_indices = @transform_2, window_bounds = array<i64: 16, 1>}, {transform_indices = @transform_3, window_bounds = array<i64: 1, 32, 256>}, {transform_indices = @transform_4, window_bounds = array<i64: 1, 16, 256>}]} {
    %c0 = arith.constant 0 : index
    %c0_0 = arith.constant 0 : index
    %0 = vector.load %arg2[%c0, %c0_0] : memref<16x32xbf16, #tpu.memory_space<vmem>>, vector<16x32xbf16>
    %c0_1 = arith.constant 0 : index
    %c0_2 = arith.constant 0 : index
    %c0_3 = arith.constant 0 : index
    %1 = vector.load %arg5[%c0_1, %c0_2, %c0_3] : memref<1x32x256xbf16, #tpu.memory_space<vmem>>, vector<1x32x256xbf16>
    %2 = vector.shape_cast %1 : vector<1x32x256xbf16> to vector<32x256xbf16>
    %cst = arith.constant dense<0.000000e+00> : vector<16x256xf32>
    %3 = tpu.matmul %0, %2, %cst {dimension_numbers = #tpu.dot_dimension_numbers<[1], [0], [0], [1], [0, 0, 1, 1], [], []>} : vector<16x32xbf16>, vector<32x256xbf16>, vector<16x256xf32> -> vector<16x256xf32>
    %c0_4 = arith.constant 0 : index
    %c0_5 = arith.constant 0 : index
    %4 = vector.load %arg3[%c0_4, %c0_5] : memref<16x1xf32, #tpu.memory_space<vmem>>, vector<16x1xf32>
    %5 = vector.broadcast %4 : vector<16x1xf32> to vector<16x256xf32>
    %6 = arith.mulf %3, %5 : vector<16x256xf32>
    %c0_6 = arith.constant 0 : index
    %c0_7 = arith.constant 0 : index
    %7 = vector.load %arg4[%c0_6, %c0_7] : memref<16x1xf32, #tpu.memory_space<vmem>>, vector<16x1xf32>
    %8 = vector.broadcast %7 : vector<16x1xf32> to vector<16x256xf32>
    %9 = arith.addf %6, %8 : vector<16x256xf32>
    %cst_8 = arith.constant 0.000000e+00 : f32
    %10 = vector.broadcast %cst_8 : f32 to vector<16x256xf32>
    %11 = arith.maximumf %9, %10 : vector<16x256xf32>
    %c0_9 = arith.constant 0 : index
    %c0_10 = arith.constant 0 : index
    %c0_11 = arith.constant 0 : index
    %12 = vector.load %arg6[%c0_9, %c0_10, %c0_11] : memref<1x16x256xf32, #tpu.memory_space<vmem>>, vector<1x16x256xf32>
    %13 = vector.shape_cast %12 : vector<1x16x256xf32> to vector<16x256xf32>
    %14 = vector.shape_cast %11 : vector<16x256xf32> to vector<1x16x256xf32>
    tpu.vector_store %arg6[%c0_9, %c0_10, %c0_11], %14 {strides = array<i32>} : memref<1x16x256xf32, #tpu.memory_space<vmem>>, vector<1x16x256xf32>,
    return
  }
  func.func @transform_0(%arg0: i32, %arg1: i32) -> (i32, i32) {
    %c0_i32 = arith.constant 0 : i32
    %c0_i32_0 = arith.constant 0 : i32
    %c0_i32_1 = arith.constant 0 : i32
    return %c0_i32, %c0_i32_0 : i32, i32
  }
  func.func @transform_1(%arg0: i32, %arg1: i32) -> (i32, i32) {
    %c0_i32 = arith.constant 0 : i32
    %c0_i32_0 = arith.constant 0 : i32
    %c0_i32_1 = arith.constant 0 : i32
    return %c0_i32, %c0_i32_0 : i32, i32
  }
  func.func @transform_2(%arg0: i32, %arg1: i32) -> (i32, i32) {
    %c0_i32 = arith.constant 0 : i32
    %c0_i32_0 = arith.constant 0 : i32
    %c0_i32_1 = arith.constant 0 : i32
    return %c0_i32, %c0_i32_0 : i32, i32
  }
  func.func @transform_3(%arg0: i32, %arg1: i32) -> (i32, i32, i32) {
    %c0_i32 = arith.constant 0 : i32
    %c0_i32_0 = arith.constant 0 : i32
    return %arg0, %c0_i32, %arg1 : i32, i32, i32
  }
  func.func @transform_4(%arg0: i32, %arg1: i32) -> (i32, i32, i32) {
    %c0_i32 = arith.constant 0 : i32
    %c0_i32_0 = arith.constant 0 : i32
    return %arg0, %c0_i32, %arg1 : i32, i32, i32
  }
}

</mosaic_0001>

<bundles_post_ra>
// kernel: conv2d_block_forward.3
= control target key start
LH: loop header
LB: loop body
LE: loop exit
PB: predicated region body
PF: predicated region fallthrough
CT: control target
= control target key end

     0   :  { %s545_s15 = smov 0   ;;  %s547_s16 = smov 0   ;;  %s600_s0 = inlined_call_operand.vmem [shape: bf16[16,32], index: 0, kind: input, shape index: {}]   ;;  %s601_s1 = inlined_call_operand.vmem [shape: f32[16,1], index: 1, kind: input, shape index: {}]   ;;  %s602_s2 = inlined_call_operand.vmem [shape: f32[16,1], index: 2, kind: input, shape index: {}]   ;;  %s603_s3 = inlined_call_operand.vmem [shape: bf16[2,32,256], index: 3, kind: input, shape index: {}]   ;;  %s604_s4 = inlined_call_operand.vmem [shape: f32[2,16,256], index: 4, kind: output, shape index: {}]  }
   0x1   :  { %s549_s17 = smov 0  }
   0x2 LB: > { %s26_s18 = sadd.s32 1, %s513_s16  ;;  %p432_p0 = scmp.ge.s32.totalorder %s517_s17, 1  ;;  %s517_s17 = sphi %s549_s17, %s14_s17   ;;  %s513_s16 = sphi %s547_s16, %s606_s16   ;;  %s509_s15 = sphi %s545_s15, %s605_s15  }
   0x3   : > { %p28_p1 = scmp.ge.s32.totalorder %s26_s18, 2  ;;  %p183_p2 = scmp.lt.s32.totalorder %s517_s17, 3 }
   0x5   : > { %s608_s18 = smov (%p28_p1, %s26_s18), 0  ;;  %p184_p3 = pnand %p432_p0, %p183_p2 }
   0x6   : > { %p218_p4 = scmp.lt.s32.totalorder (!%p184_p3), %s509_s15, 1 }
   0x7   : > { %187 = sbr.rel (%p184_p3) target bundleno = 168 (0xa8), region = 36 }
   0xc   : > { %v301_v0 = vld [vmem:[%s601_s1] sm:$0xff]  ;;  %v519_v2 = vmov 0   ;;  %s610_s15 = smov (!%p218_p4, %s509_s15), 1  ;;  %v302_v3 = vld [vmem:[%s601_s1 + $0x8] sm:$0xff]  ;;  %vm269_vm0 = vcmask 261120  }
   0xd   : > { %v317_v1 = vld [vmem:[%s602_s2] sm:$0xff]  ;;  %493 = vset.pattern.permute.xlu0 %v519_v2  ;;  %494 = vset.pattern.permute.xlu1 %v519_v2  ;;  %s461_s23 = sshll.u32 %s610_s15, 5  ;;  %v318_v14 = vld [vmem:[%s602_s2 + $0x8] sm:$0xff] }
   0xe   : > { %305 = vperm.xlu0 %493, %v301_v0   ;;  %321 = vperm.xlu1 %494, %v317_v1   ;;  %s225_s26 = scalar_lea.vmem %s603_s3, %s461_s23  ;;  %v463_v17 = vld [vmem:[%s600_s0] sm:$0xff]  ;;  %s235_s9 = scalar_lea.vmem %s604_s4, %s461_s23 }
   0xf   : > { %v451_v4 = vld [vmem:[%s225_s26 + $0x10] sm:$0xf]  ;;  %v467_v5 = vld [vmem:[%s225_s26 + $0x14] sm:$0xf0]  ;;  %v466_v6 = vld [vmem:[%s225_s26 + $0x14] sm:$0xf] }
  0x10   : > { %v452_v7 = vor.u32 %v467_v5, %v451_v4  ;;  %v453_v8 = vld [vmem:[%s225_s26 + $0x18] sm:$0xf0]  ;;  %v443_v9 = vld [vmem:[%s225_s26] sm:$0xf]  ;;  %v465_v10 = vld [vmem:[%s225_s26 + $0x4] sm:$0xf0] }
  0x11   : > { %v456_v11 = vor.u32 %v466_v6, %v453_v8  ;;  %v464_v12 = vld [vmem:[%s225_s26 + $0x4] sm:$0xf]  ;;  %v445_v13 = vld [vmem:[%s225_s26 + $0x8] sm:$0xf0]  ;;  %v444_v15 = vor.u32 %v465_v10, %v443_v9 }
  0x12   : > { %279 = vmatpush.bf16.msra.mxu0 %v452_v7  ;;  %v448_v16 = vor.u32 %v464_v12, %v445_v13 }
  0x13   : > { %293 = vmatpush.bf16.msra.mxu1 %v456_v11 }
  0x16   : > { %310 = vperm.xlu0 %493, %v302_v3   ;;  %326 = vperm.xlu1 %494, %v318_v14  }
  0x17   : > { %280 = vmatpush.bf16.msra.mxu0 %v444_v15  ;;  %294 = vmatpush.bf16.msra.mxu1 %v448_v16 }
  0x1a   : > { %457 = vmatmul.msk.bf16.vlgmr.msra.gmra.mxu0 %vm269_vm0, %v463_v17  ;;  %458 = vmatmul.msk.bf16.vlgmr.msra.gmra.mxu1 %vm269_vm0, %v463_v17 }
  0x80   : > { %v306_v18 = vpop.permute.xlu0 %305  ;;  %v322_v19 = vpop.permute.xlu1 %321 }
  0x88   : > { %v311_v28 = vpop.permute.xlu0 %310  ;;  %v327_v32 = vpop.permute.xlu1 %326 }
  0x97   : > { %v282_v20 = vpop.f32.mrf.mxu0  ;;  %v296_v22 = vpop.f32.mrf.mxu1 }
  0x98   : > { %v313_v21 = vmul.f32 %v306_v18, %v282_v20  ;;  %v314_v23 = vmul.f32 %v306_v18, %v296_v22 }
  0x9a   : > { %v329_v24 = vadd.f32 %v322_v19, %v313_v21  ;;  %v330_v25 = vadd.f32 %v322_v19, %v314_v23 }
  0x9c   : > { %v333_v26 = vmax.f32 %v329_v24, 0.0  ;;  %v334_v27 = vmax.f32 %v330_v25, 0.0 }
  0x9e   : > { %337 = vst [vmem:[%s235_s9] sm:$0xff] %v333_v26 }
  0x9f   : > { %338 = vst [vmem:[%s235_s9 + $0x8] sm:$0xff] %v334_v27  ;;  %v284_v29 = vpop.f32.mrf.mxu0  ;;  %v298_v31 = vpop.f32.mrf.mxu1 }
  0xa0   : > { %v315_v30 = vmul.f32 %v311_v28, %v284_v29  ;;  %v316_v33 = vmul.f32 %v311_v28, %v298_v31 }
  0xa2   : > { %v331_v34 = vadd.f32 %v327_v32, %v315_v30  ;;  %v332_v35 = vadd.f32 %v327_v32, %v316_v33 }
  0xa4   : > { %v335_v36 = vmax.f32 %v331_v34, 0.0  ;;  %v336_v37 = vmax.f32 %v332_v35, 0.0 }
  0xa6   : > { %339 = vst [vmem:[%s235_s9 + $0x10] sm:$0xff] %v335_v36 }
  0xa7   : > { %340 = vst [vmem:[%s235_s9 + $0x18] sm:$0xff] %v336_v37 }
  0xa8 PF: > { %s14_s17 = sadd.s32 1, %s517_s17   ;;  %s605_s15 = smov %s513_s16 }
  0xa9   : > { %p11_p5 = scmp.ge.s32.totalorder %s14_s17, 4   ;;  %s606_s16 = smov %s608_s18 }
  0xab   :  { %13 = sbr.rel (!%p11_p5) target bundleno = 2 (0x2), region = 66 }

// kernel: conv2d_block_forward.2
= control target key start
LH: loop header
LB: loop body
LE: loop exit
PB: predicated region body
PF: predicated region fallthrough
CT: control target
= control target key end

     0   :  { %s570_s12 = smov 0   ;;  %s572_s13 = smov 0   ;;  %s613_s0 = inlined_call_operand.vmem [shape: bf16[16,32], index: 0, kind: input, shape index: {}]   ;;  %s614_s1 = inlined_call_operand.vmem [shape: bf16[2,32,256], index: 1, kind: input, shape index: {}]   ;;  %s615_s2 = inlined_call_operand.vmem [shape: f32[2,1,16,1], index: 2, kind: output, shape index: {0}]   ;;  %s616_s3 = inlined_call_operand.vmem [shape: f32[2,1,16,1], index: 3, kind: output, shape index: {1}]  }
   0x1   :  { %s574_s14 = smov 0  }
   0x2 LB: > { %s26_s15 = sadd.s32 1, %s544_s13  ;;  %p463_p0 = scmp.ge.s32.totalorder %s548_s14, 1  ;;  %s548_s14 = sphi %s574_s14, %s14_s14   ;;  %s544_s13 = sphi %s572_s13, %s618_s13   ;;  %s540_s12 = sphi %s570_s12, %s617_s12  }
   0x3   : > { %p28_p1 = scmp.ge.s32.totalorder %s26_s15, 2  ;;  %p163_p2 = scmp.lt.s32.totalorder %s548_s14, 3 }
   0x5   : > { %s620_s15 = smov (%p28_p1, %s26_s15), 0  ;;  %p164_p3 = pnand %p463_p0, %p163_p2 }
   0x6   : > { %p205_p4 = scmp.lt.s32.totalorder (!%p164_p3), %s540_s12, 1 }
   0x7   : > { %167 = sbr.rel (%p164_p3) target bundleno = 281 (0x119), region = 28 }
   0xc   : > { %s622_s12 = smov (!%p205_p4, %s540_s12), 1  ;;  %v497_v12 = vld [vmem:[%s613_s0] sm:$0xff]  ;;  %vm264_vm0 = vcmask 261120   ;;  %vm302_vm1 = vcmask 7168  }
   0xd   : > { %s494_s16 = sshll.u32 %s622_s12, 5  ;;  %s495_s22 = sshll.u32 %s622_s12, 4 }
   0xe   : > { %s212_s19 = scalar_lea.vmem %s614_s1, %s494_s16  ;;  %s222_s25 = scalar_lea.vmem %s615_s2, %s495_s22 }
   0xf   : > { %v484_v0 = vld [vmem:[%s212_s19 + $0x10] sm:$0xf]  ;;  %v501_v1 = vld [vmem:[%s212_s19 + $0x14] sm:$0xf0]  ;;  %v500_v2 = vld [vmem:[%s212_s19 + $0x14] sm:$0xf]  ;;  %s231_s28 = scalar_lea.vmem %s616_s3, %s495_s22 }
  0x10   : > { %v485_v3 = vor.u32 %v501_v1, %v484_v0  ;;  %v486_v4 = vld [vmem:[%s212_s19 + $0x18] sm:$0xf0]  ;;  %v476_v5 = vld [vmem:[%s212_s19] sm:$0xf]  ;;  %v499_v6 = vld [vmem:[%s212_s19 + $0x4] sm:$0xf0] }
  0x11   : > { %v489_v7 = vor.u32 %v500_v2, %v486_v4  ;;  %v498_v8 = vld [vmem:[%s212_s19 + $0x4] sm:$0xf]  ;;  %v478_v9 = vld [vmem:[%s212_s19 + $0x8] sm:$0xf0]  ;;  %v477_v10 = vor.u32 %v499_v6, %v476_v5 }
  0x12   : > { %274 = vmatpush.bf16.msra.mxu0 %v485_v3  ;;  %v481_v11 = vor.u32 %v498_v8, %v478_v9 }
  0x13   : > { %288 = vmatpush.bf16.msra.mxu1 %v489_v7 }
  0x16   : > { %275 = vmatpush.bf16.msra.mxu0 %v477_v10 }
  0x17   : > { %289 = vmatpush.bf16.msra.mxu1 %v481_v11 }
  0x19   : > { %490 = vmatmul.msk.bf16.vlgmr.msra.gmra.mxu0 %vm264_vm0, %v497_v12 }
  0x1a   : > { %491 = vmatmul.msk.bf16.vlgmr.msra.gmra.mxu1 %vm264_vm0, %v497_v12 }
  0x96   : > { %v277_v13 = vpop.f32.mrf.mxu0 }
  0x97   : > { %v305_v14 = vmul.f32 %v277_v13, %v277_v13  ;;  %v291_v15 = vpop.f32.mrf.mxu1 }
  0x98   : > { %v306_v16 = vmul.f32 %v291_v15, %v291_v15  ;;  %v296_v17 = vadd.f32 %v291_v15, %v277_v13 }
  0x9a   : > { %297 = vadd.xlane.f32.xlu0 %v296_v17  ;;  %v309_v18 = vadd.f32 %v306_v16, %v305_v14 }
  0x9c   : > { %310 = vadd.xlane.f32.xlu1 %v309_v18 }
  0x9e   : > { %v279_v19 = vpop.f32.mrf.mxu0 }
  0x9f   : > { %v307_v20 = vmul.f32 %v279_v19, %v279_v19  ;;  %v293_v21 = vpop.f32.mrf.mxu1 }
  0xa0   : > { %v299_v22 = vadd.f32 %v293_v21, %v279_v19  ;;  %v308_v23 = vmul.f32 %v293_v21, %v293_v21 }
  0xa2   : > { %300 = vadd.xlane.f32.xlu0 %v299_v22  ;;  %v312_v24 = vadd.f32 %v308_v23, %v307_v20 }
  0xa4   : > { %313 = vadd.xlane.f32.xlu1 %v312_v24 }
 0x10d   : > { %v298_v25 = vpop.xlane.xlu0 %297 }
 0x10e   : > { %303 = vst.msk [vmem:[%s222_s25] sm:$0xff] %vm302_vm1, %v298_v25 }
 0x10f   : > { %v311_v26 = vpop.xlane.xlu1 %310 }
 0x110   : > { %315 = vst.msk [vmem:[%s231_s28] sm:$0xff] %vm302_vm1, %v311_v26 }
 0x115   : > { %v301_v27 = vpop.xlane.xlu0 %300 }
 0x116   : > { %304 = vst.msk [vmem:[%s222_s25 + $0x8] sm:$0xff] %vm302_vm1, %v301_v27 }
 0x117   : > { %v314_v28 = vpop.xlane.xlu1 %313 }
 0x118   : > { %316 = vst.msk [vmem:[%s231_s28 + $0x8] sm:$0xff] %vm302_vm1, %v314_v28 }
 0x119 PF: > { %s14_s14 = sadd.s32 1, %s548_s14   ;;  %s617_s12 = smov %s544_s13 }
 0x11a   : > { %p11_p5 = scmp.ge.s32.totalorder %s14_s14, 4   ;;  %s618_s13 = smov %s620_s15 }
 0x11c   :  { %13 = sbr.rel (!%p11_p5) target bundleno = 2 (0x2), region = 70 }

</bundles_post_ra>
